<compile_context>
chip_gen: v7x
topology: tpu7x:2x2x1
jax: 0.10.0
libtpu: 0.0.40
codegen_flags: <defaults>
</compile_context>

<pallas_src>
import functools

import jax
import jax.numpy as jnp
from jax.experimental import pallas as pl
from jax.experimental.pallas import tpu as pltpu

EPS = 1e-5  # BatchNorm2d default


def _round_up(x, m):
    return ((x + m - 1) // m) * m


def _tpu_vmem_bytes():
    """Physical VMEM of the local chip; conservative fallback if the query fails."""
    try:
        return int(pltpu.get_tpu_info().vmem_capacity_bytes)
    except Exception:
        return 64 << 20  # v7x-sized fallback (smallest of v5e/v6e/v7x)


@functools.cache
def _single_buffer_supported():
    """Probe whether BlockSpec(pipeline_mode=pl.Buffered(1)) lowers on this backend."""
    def _probe_kernel(w_ref, x_ref, o_ref):
        o_ref[...] = x_ref[...] + w_ref[...]

    try:
        w_spec = pl.BlockSpec((8, 128), lambda i: (0, 0), pipeline_mode=pl.Buffered(1))
        fn = pl.pallas_call(
            _probe_kernel,
            grid=(2,),
            in_specs=[w_spec, pl.BlockSpec((8, 128), lambda i: (i, 0))],
            out_specs=pl.BlockSpec((8, 128), lambda i: (i, 0)),
            out_shape=jax.ShapeDtypeStruct((16, 128), jnp.float32),
        )
        w = jnp.zeros((8, 128), jnp.float32)
        x = jnp.zeros((16, 128), jnp.float32)
        jax.jit(fn).lower(w, x).compile()
        return True
    except Exception:
        return False


def _pick_row_tile(nc, hw, max_bytes):
    """Row tile for the stats pass: must divide nc and be a multiple of 8 (or == nc)."""
    cap = max(1, max_bytes // (hw * 4))
    if nc <= cap:
        return nc                              # full first dim is always legal
    if nc % 8 == 0:
        d = (min(cap, nc) // 8) * 8
        while d >= 8:
            if nc % d == 0:
                return d
            d -= 8
    return None                                # pathological -> caller uses XLA fallback


def _pick_px_tile(hw, max_px):
    """Pixel (lane) tile: a multiple of 128 dividing hw, hw itself, or pad hw."""
    max_px = max(128, max_px)
    if hw <= max_px:
        return hw, hw                          # full dim: legal, no padding
    d = (max_px // 128) * 128
    while d >= 128:
        if hw % d == 0:
            return d, hw
        d -= 128
    t = (max_px // 128) * 128
    return t, _round_up(hw, t)                 # rare: pad pixels, slice afterwards


# --------------------------------------------------------------------------------------
# Pass 1: batch statistics from f32 x.  Each row of the (N*C, H*W) view is one (n, c)
# image plane; the kernel emits the row sum and a row-CENTERED sum of squares, which the
# wrapper combines per channel with the parallel-variance formula (no E[x^2]-E[x]^2
# cancellation, no bf16 rounding).  Grid axis is fully parallel (v7x: both TCs).
# --------------------------------------------------------------------------------------
def _stats_kernel(x_ref, sum_ref, m2_ref):
    xb = x_ref[...]                                        # (TR, HW) f32
    hw = xb.shape[1]
    s = jnp.sum(xb, axis=1, keepdims=True)                 # (TR, 1)
    mu = s * (1.0 / hw)
    d = xb - mu
    sum_ref[...] = s
    m2_ref[...] = jnp.sum(d * d, axis=1, keepdims=True)    # centered second moment


# --------------------------------------------------------------------------------------
# Pass 2: conv-as-matmul with BN folded into the weights, transposed orientation so the
# output block (Cout, t_px) is already NCHW layout.  f32 MXU accumulate, one bias add.
# --------------------------------------------------------------------------------------
def _conv_matmul_kernel(w_ref, b_ref, xp_ref, o_ref):
    # w_ref: (Cout, 4C) resident folded weights; b_ref: (Cout, 1) f32 bias
    # xp_ref: (1, 4C, t_px) patch block;  o_ref: (1, Cout, t_px) output block
    acc = jnp.dot(w_ref[...], xp_ref[0], preferred_element_type=jnp.float32)
    o_ref[0] = (acc + b_ref[...]).astype(o_ref.dtype)


def downsample_layer(x, gamma, beta, weight, bias, *,
                     matmul_dtype=jnp.bfloat16, out_dtype=None):
    """x: (N, C, H, W) f32; weight: (Cout, Cin, 2, 2); returns (N, Cout, H//2, W//2)."""
    N, C, H, W = x.shape
    Cout = weight.shape[0]
    Ho, Wo = H // 2, W // 2
    HoWo = Ho * Wo
    K4 = 4 * C

    x = x.astype(jnp.float32)
    out_dtype = x.dtype if out_dtype is None else out_dtype
    mm_bytes = jnp.dtype(matmul_dtype).itemsize
    out_bytes = jnp.dtype(out_dtype).itemsize

    phys_vmem = _tpu_vmem_bytes()
    vmem_limit = int(phys_vmem * 0.85)          # explicit scoped-VMEM override per chip
    block_budget = phys_vmem // 2               # what we allow our blocks to occupy

    # ---- pass 1: batch statistics (f32, centered, Pallas) ----
    NC, HW = N * C, H * W
    x2d = x.reshape(NC, HW)                     # free reshape (row-major merge)
    tr = _pick_row_tile(NC, HW, min(2 << 20, block_budget // 8))
    if tr is None:
        # Pathological shape that cannot be tiled legally -> tiny XLA fallback.
        mean = jnp.mean(x, axis=(0, 2, 3))
        var = jnp.mean((x - mean.reshape(1, C, 1, 1)) ** 2, axis=(0, 2, 3))
    else:
        row_sum, row_m2 = pl.pallas_call(
            _stats_kernel,
            grid=(NC // tr,),
            in_specs=[pl.BlockSpec((tr, HW), lambda i: (i, 0))],
            out_specs=(pl.BlockSpec((tr, 1), lambda i: (i, 0)),
                       pl.BlockSpec((tr, 1), lambda i: (i, 0))),
            out_shape=(jax.ShapeDtypeStruct((NC, 1), jnp.float32),
                       jax.ShapeDtypeStruct((NC, 1), jnp.float32)),
            compiler_params=pltpu.CompilerParams(
                dimension_semantics=("parallel",),
                vmem_limit_bytes=vmem_limit),
        )(x2d)
        row_sum = row_sum.reshape(N, C)
        row_m2 = row_m2.reshape(N, C)
        count = jnp.float32(N * HW)
        mean = row_sum.sum(axis=0) / count                      # (C,)
        row_mean = row_sum / jnp.float32(HW)
        # parallel-variance combine (per channel) of per-(n,c) centered sums
        var = (row_m2.sum(axis=0)
               + jnp.float32(HW) * jnp.sum((row_mean - mean) ** 2, axis=0)) / count
    var = jnp.maximum(var, 0.0)                                 # biased var (PyTorch BN normalize)
    inv_std = jax.lax.rsqrt(var + EPS)
    scale = gamma.astype(jnp.float32) * inv_std                 # (C,)
    shift = beta.astype(jnp.float32) - mean * scale             # (C,)

    # ---- fold BN into conv weight / bias (tiny f32 math in the wrapper) ----
    # W_torch[co, ci, kh, kw] -> Wfold[co, (kh*2+kw)*C + ci]  (matches patch K layout)
    w_taps = jnp.transpose(weight.astype(jnp.float32), (0, 2, 3, 1)).reshape(Cout, 4, C)
    w_fold = (w_taps * scale[None, None, :]).reshape(Cout, K4).astype(matmul_dtype)
    b_fold = (bias.astype(jnp.float32) + w_taps.sum(axis=1) @ shift).reshape(Cout, 1)

    # ---- glue: NCHW -> transposed patch tensor (N, 4C, Ho*Wo), one XLA copy ----
    # xpT[n, (kh*2+kw)*C + c, ho*Wo + wo] = x[n, c, 2*ho+kh, 2*wo+kw]
    xp = x.reshape(N, C, Ho, 2, Wo, 2)
    xp = jnp.transpose(xp, (0, 3, 5, 1, 2, 4)).reshape(N, K4, HoWo).astype(matmul_dtype)

    # ---- pass 2 tiling / VMEM accounting (per-chip) ----
    single_buf = _single_buffer_supported()
    w_bufs = 1 if single_buf else 2
    resident = Cout * K4 * mm_bytes * w_bufs + Cout * 4 * w_bufs     # weights + bias
    per_px = 2 * (K4 * mm_bytes + Cout * out_bytes)                   # dbl-buffered xp/out
    px_cap = int(max(128, min(2048, (block_budget - resident) // per_px)))
    t_px, hw_pad = _pick_px_tile(HoWo, px_cap)
    if hw_pad != HoWo:
        xp = jnp.pad(xp, ((0, 0), (0, 0), (0, hw_pad - HoWo)))       # zero px: sliced off later

    w_kwargs = dict(pipeline_mode=pl.Buffered(1)) if single_buf else {}
    out_nchw = pl.pallas_call(
        _conv_matmul_kernel,
        grid=(N, hw_pad // t_px),
        in_specs=[pl.BlockSpec((Cout, K4), lambda n, j: (0, 0), **w_kwargs),
                  pl.BlockSpec((Cout, 1), lambda n, j: (0, 0), **w_kwargs),
                  pl.BlockSpec((1, K4, t_px), lambda n, j: (n, 0, j))],
        out_specs=pl.BlockSpec((1, Cout, t_px), lambda n, j: (n, 0, j)),
        out_shape=jax.ShapeDtypeStruct((N, Cout, hw_pad), out_dtype),
        compiler_params=pltpu.CompilerParams(
            dimension_semantics=("parallel", "parallel"),
            vmem_limit_bytes=vmem_limit),
    )(w_fold, b_fold, xp)

    if hw_pad != HoWo:
        out_nchw = out_nchw[:, :, :HoWo]
    return out_nchw.reshape(N, Cout, Ho, Wo)     # free reshape: already NCHW layout


def _reference(x, gamma, beta, weight, bias):
    # Pure-JAX f32 reference matching PyTorch training-mode BN + Conv2d(k=2, s=2).
    mean = x.mean(axis=(0, 2, 3), keepdims=True)
    var = ((x - mean) ** 2).mean(axis=(0, 2, 3), keepdims=True)
    xn = (x - mean) / jnp.sqrt(var + EPS)
    xn = xn * gamma.reshape(1, -1, 1, 1) + beta.reshape(1, -1, 1, 1)
    out = jax.lax.conv_general_dilated(
        xn, weight, window_strides=(2, 2), padding="VALID",
        dimension_numbers=("NCHW", "OIHW", "NCHW"),
    )
    return out + bias.reshape(1, -1, 1, 1)


if __name__ == "__main__":
    key = jax.random.PRNGKey(0)
    k_x, k_w, k_b = jax.random.split(key, 3)

    N, C, H, W = 2, 4, 16, 16
    x = jax.random.normal(k_x, (N, C, H, W), dtype=jnp.float32)

    # BatchNorm2d params: PyTorch default init (weight=1, bias=0)
    gamma = jnp.ones((C,), jnp.float32)
    beta = jnp.zeros((C,), jnp.float32)

    # Conv2d(C, C, k=2, s=2) params: uniform in +/- 1/sqrt(fan_in)
    fan_in = C * 2 * 2
    bound = 1.0 / (fan_in ** 0.5)
    weight = jax.random.uniform(k_w, (C, C, 2, 2), jnp.float32, -bound, bound)
    bias = jax.random.uniform(k_b, (C,), jnp.float32, -bound, bound)

    fn = jax.jit(downsample_layer, static_argnames=("matmul_dtype", "out_dtype"))
    ref = _reference(x, gamma, beta, weight, bias)

    # f32 MXU path (tight tolerance): validates patch indexing / BN folding exactly.
    out_f32 = jax.block_until_ready(
        fn(x, gamma, beta, weight, bias, matmul_dtype=jnp.float32))
    assert out_f32.shape == (N, C, H // 2, W // 2), out_f32.shape
    assert jnp.allclose(out_f32, ref, atol=1e-3, rtol=1e-3), \
        float(jnp.max(jnp.abs(out_f32 - ref)))

    # bf16 MXU path (production dtype): tolerance accounts for bf16 operand rounding.
    out_bf16 = jax.block_until_ready(
        fn(x, gamma, beta, weight, bias, matmul_dtype=jnp.bfloat16))
    assert out_bf16.shape == (N, C, H // 2, W // 2), out_bf16.shape
    assert jnp.allclose(out_bf16, ref, atol=5e-2, rtol=5e-2), \
        float(jnp.max(jnp.abs(out_bf16 - ref)))

    print("KERNEL_OK")
</pallas_src>

<mosaic_0001>
module attributes {stable_mosaic.version = 11 : i64} {
  func.func @_stats_kernel(%arg0: i32, %arg1: memref<8x256xf32, #tpu.memory_space<vmem>>, %arg2: memref<8x1xf32, #tpu.memory_space<vmem>>, %arg3: memref<8x1xf32, #tpu.memory_space<vmem>>) attributes {dimension_semantics = [#tpu.dimension_semantics<parallel>], iteration_bounds = array<i64: 1>, scalar_prefetch = 0 : i64, scratch_operands = 0 : i64, tpu.core_type = #tpu.core_type<tc>, window_params = [{transform_indices = @transform_0, window_bounds = array<i64: 8, 256>}, {transform_indices = @transform_1, window_bounds = array<i64: 8, 1>}, {transform_indices = @transform_2, window_bounds = array<i64: 8, 1>}]} {
    %c0 = arith.constant 0 : index
    %c0_0 = arith.constant 0 : index
    %0 = vector.load %arg1[%c0, %c0_0] : memref<8x256xf32, #tpu.memory_space<vmem>>, vector<8x256xf32>
    %cst = arith.constant dense<0.000000e+00> : vector<8xf32>
    %1 = vector.multi_reduction <add>, %0, %cst [1] : vector<8x256xf32> to vector<8xf32>
    %2 = vector.shape_cast %1 : vector<8xf32> to vector<8x1xf32>
    %cst_1 = arith.constant 3.906250e-03 : f32
    %3 = vector.broadcast %cst_1 : f32 to vector<8x1xf32>
    %4 = arith.mulf %2, %3 : vector<8x1xf32>
    %5 = vector.broadcast %4 : vector<8x1xf32> to vector<8x256xf32>
    %6 = arith.subf %0, %5 : vector<8x256xf32>
    %c0_2 = arith.constant 0 : index
    %c0_3 = arith.constant 0 : index
    %7 = vector.load %arg2[%c0_2, %c0_3] : memref<8x1xf32, #tpu.memory_space<vmem>>, vector<8x1xf32>
    tpu.vector_store %arg2[%c0_2, %c0_3], %2 {strides = array<i32>} : memref<8x1xf32, #tpu.memory_space<vmem>>, vector<8x1xf32>,
    %8 = arith.mulf %6, %6 : vector<8x256xf32>
    %cst_4 = arith.constant dense<0.000000e+00> : vector<8xf32>
    %9 = vector.multi_reduction <add>, %8, %cst_4 [1] : vector<8x256xf32> to vector<8xf32>
    %10 = vector.shape_cast %9 : vector<8xf32> to vector<8x1xf32>
    %c0_5 = arith.constant 0 : index
    %c0_6 = arith.constant 0 : index
    %11 = vector.load %arg3[%c0_5, %c0_6] : memref<8x1xf32, #tpu.memory_space<vmem>>, vector<8x1xf32>
    tpu.vector_store %arg3[%c0_5, %c0_6], %10 {strides = array<i32>} : memref<8x1xf32, #tpu.memory_space<vmem>>, vector<8x1xf32>,
    return
  }
  func.func @transform_0(%arg0: i32) -> (i32, i32) {
    %c0_i32 = arith.constant 0 : i32
    %c0_i32_0 = arith.constant 0 : i32
    return %arg0, %c0_i32 : i32, i32
  }
  func.func @transform_1(%arg0: i32) -> (i32, i32) {
    %c0_i32 = arith.constant 0 : i32
    %c0_i32_0 = arith.constant 0 : i32
    return %arg0, %c0_i32 : i32, i32
  }
  func.func @transform_2(%arg0: i32) -> (i32, i32) {
    %c0_i32 = arith.constant 0 : i32
    %c0_i32_0 = arith.constant 0 : i32
    return %arg0, %c0_i32 : i32, i32
  }
}

module attributes {stable_mosaic.version = 11 : i64} {
  func.func @_conv_matmul_kernel(%arg0: i32, %arg1: i32, %arg2: memref<4x16xf32, #tpu.memory_space<vmem>>, %arg3: memref<4x1xf32, #tpu.memory_space<vmem>>, %arg4: memref<1x16x64xf32, #tpu.memory_space<vmem>>, %arg5: memref<1x4x64xf32, #tpu.memory_space<vmem>>) attributes {dimension_semantics = [#tpu.dimension_semantics<parallel>, #tpu.dimension_semantics<parallel>], iteration_bounds = array<i64: 2, 1>, scalar_prefetch = 0 : i64, scratch_operands = 0 : i64, tpu.core_type = #tpu.core_type<tc>, window_params = [{pipeline_mode = #tpu.pipeline_mode<synchronous>, transform_indices = @transform_0, window_bounds = array<i64: 4, 16>}, {pipeline_mode = #tpu.pipeline_mode<synchronous>, transform_indices = @transform_1, window_bounds = array<i64: 4, 1>}, {transform_indices = @transform_2, window_bounds = array<i64: 1, 16, 64>}, {transform_indices = @transform_3, window_bounds = array<i64: 1, 4, 64>}]} {
    %c0 = arith.constant 0 : index
    %c0_0 = arith.constant 0 : index
    %0 = vector.load %arg2[%c0, %c0_0] : memref<4x16xf32, #tpu.memory_space<vmem>>, vector<4x16xf32>
    %c0_1 = arith.constant 0 : index
    %c0_2 = arith.constant 0 : index
    %c0_3 = arith.constant 0 : index
    %1 = vector.load %arg4[%c0_1, %c0_2, %c0_3] : memref<1x16x64xf32, #tpu.memory_space<vmem>>, vector<1x16x64xf32>
    %2 = vector.shape_cast %1 : vector<1x16x64xf32> to vector<16x64xf32>
    %cst = arith.constant dense<0.000000e+00> : vector<4x64xf32>
    %3 = tpu.matmul %0, %2, %cst {dimension_numbers = #tpu.dot_dimension_numbers<[1], [0], [0], [1], [0, 0, 1, 1], [], []>} : vector<4x16xf32>, vector<16x64xf32>, vector<4x64xf32> -> vector<4x64xf32>
    %c0_4 = arith.constant 0 : index
    %c0_5 = arith.constant 0 : index
    %4 = vector.load %arg3[%c0_4, %c0_5] : memref<4x1xf32, #tpu.memory_space<vmem>>, vector<4x1xf32>
    %5 = vector.broadcast %4 : vector<4x1xf32> to vector<4x64xf32>
    %6 = arith.addf %3, %5 : vector<4x64xf32>
    %c0_6 = arith.constant 0 : index
    %c0_7 = arith.constant 0 : index
    %c0_8 = arith.constant 0 : index
    %7 = vector.load %arg5[%c0_6, %c0_7, %c0_8] : memref<1x4x64xf32, #tpu.memory_space<vmem>>, vector<1x4x64xf32>
    %8 = vector.shape_cast %7 : vector<1x4x64xf32> to vector<4x64xf32>
    %9 = vector.shape_cast %6 : vector<4x64xf32> to vector<1x4x64xf32>
    tpu.vector_store %arg5[%c0_6, %c0_7, %c0_8], %9 {strides = array<i32>} : memref<1x4x64xf32, #tpu.memory_space<vmem>>, vector<1x4x64xf32>,
    return
  }
  func.func @transform_0(%arg0: i32, %arg1: i32) -> (i32, i32) {
    %c0_i32 = arith.constant 0 : i32
    %c0_i32_0 = arith.constant 0 : i32
    %c0_i32_1 = arith.constant 0 : i32
    return %c0_i32, %c0_i32_0 : i32, i32
  }
  func.func @transform_1(%arg0: i32, %arg1: i32) -> (i32, i32) {
    %c0_i32 = arith.constant 0 : i32
    %c0_i32_0 = arith.constant 0 : i32
    %c0_i32_1 = arith.constant 0 : i32
    return %c0_i32, %c0_i32_0 : i32, i32
  }
  func.func @transform_2(%arg0: i32, %arg1: i32) -> (i32, i32, i32) {
    %c0_i32 = arith.constant 0 : i32
    %c0_i32_0 = arith.constant 0 : i32
    return %arg0, %c0_i32, %arg1 : i32, i32, i32
  }
  func.func @transform_3(%arg0: i32, %arg1: i32) -> (i32, i32, i32) {
    %c0_i32 = arith.constant 0 : i32
    %c0_i32_0 = arith.constant 0 : i32
    return %arg0, %c0_i32, %arg1 : i32, i32, i32
  }
}

</mosaic_0001>

<bundles_post_ra>
// kernel: downsample_layer.2
= control target key start
LH: loop header
LB: loop body
LE: loop exit
PB: predicated region body
PF: predicated region fallthrough
CT: control target
= control target key end

     0   :  { %vm18_vm0 = vcmask 7168   ;;  %s61_s0 = inlined_call_operand.vmem [shape: f32[8,256], index: 0, kind: input, shape index: {}]   ;;  %s62_s1 = inlined_call_operand.vmem [shape: f32[8,1], index: 1, kind: output, shape index: {0}]   ;;  %s63_s2 = inlined_call_operand.vmem [shape: f32[8,1], index: 2, kind: output, shape index: {1}]  }
   0x1   :  { %v10_v0 = vld [vmem:[%s61_s0] sm:$0xff]  ;;  %v11_v1 = vld [vmem:[%s61_s0 + $0x8] sm:$0xff] }
   0x2   :  { %v12_v2 = vadd.f32 %v11_v1, %v10_v0 }
   0x4   :  { %13 = vadd.xlane.f32.xlu0 %v12_v2 }
  0x91   :  { %v14_v3 = vpop.xlane.xlu0 %13 }
  0x92   :  { %v15_v4 = vmul.f32 0.00390625, %v14_v3  ;;  %19 = vst.msk [vmem:[%s62_s1] sm:$0xff] %vm18_vm0, %v14_v3 }
  0x94   :  { %v16_v5 = vsub.f32 %v10_v0, %v15_v4  ;;  %v17_v6 = vsub.f32 %v11_v1, %v15_v4 }
  0x96   :  { %v20_v7 = vmul.f32 %v16_v5, %v16_v5  ;;  %v21_v8 = vmul.f32 %v17_v6, %v17_v6 }
  0x98   :  { %v22_v9 = vadd.f32 %v21_v8, %v20_v7 }
  0x9a   :  { %23 = vadd.xlane.f32.xlu0 %v22_v9 }
 0x127   :  { %v24_v10 = vpop.xlane.xlu0 %23 }
 0x128   :  { %25 = vst.msk [vmem:[%s63_s2] sm:$0xff] %vm18_vm0, %v24_v10 }

// kernel: downsample_layer.3
= control target key start
LH: loop header
LB: loop body
LE: loop exit
PB: predicated region body
PF: predicated region fallthrough
CT: control target
= control target key end

     0   :  { %s464_s12 = smov 0   ;;  %s466_s13 = smov 0   ;;  %s503_s0 = inlined_call_operand.vmem [shape: f32[4,16], index: 0, kind: input, shape index: {}]   ;;  %s504_s1 = inlined_call_operand.vmem [shape: f32[4,1], index: 1, kind: input, shape index: {}]   ;;  %s505_s2 = inlined_call_operand.vmem [shape: f32[2,16,64], index: 2, kind: input, shape index: {}]   ;;  %s506_s3 = inlined_call_operand.vmem [shape: f32[2,4,64], index: 3, kind: output, shape index: {}]  }
   0x1   :  { %s468_s14 = smov 0  }
   0x2 LB: > { %s25_s15 = sadd.s32 1, %s434_s13  ;;  %p366_p0 = scmp.ge.s32.totalorder %s438_s14, 1  ;;  %s438_s14 = sphi %s468_s14, %s13_s14   ;;  %s434_s13 = sphi %s466_s13, %s508_s13   ;;  %s430_s12 = sphi %s464_s12, %s507_s12  }
   0x3   : > { %p27_p1 = scmp.ge.s32.totalorder %s25_s15, 2  ;;  %p156_p2 = scmp.lt.s32.totalorder %s438_s14, 3 }
   0x5   : > { %s510_s15 = smov (%p27_p1, %s25_s15), 0  ;;  %p157_p3 = pnand %p366_p0, %p156_p2 }
   0x6   : > { %p185_p4 = scmp.lt.s32.totalorder (!%p157_p3), %s430_s12, 1  ;;  %v440_v0 = vmov (!%p157_p3), 0.0|0.0   ;;  %vm441_vm0 = vmmov (!%p157_p3), 0   ;;  %v442_v1 = vmov (!%p157_p3), 0.0   ;;  %v203_v2 = vld [vmem:[%s504_s1] sm:$0xf] (!%p157_p3) }
   0x7   : > { %160 = sbr.rel (%p157_p3) target bundleno = 238 (0xee), region = 32  ;;  %384 = vmatprep.subr.bf16.mxu0 (!%p157_p3), %v440_v0  ;;  %381 = vmatprep.mubr.msk.f32.mxu0 (!%p157_p3), %vm441_vm0, %v442_v1  ;;  %v443_v3 = vmov (!%p157_p3), 0   ;;  %v200_v7 = vld [vmem:[%s503_s0] sm:$0xf] (!%p157_p3)  ;;  %vm209_vm1 = vcmask (!%p157_p3), 130048   ;;  %vm283_vm2 = vcmask (!%p157_p3), 519168  }
   0x8   : > { %415 = vset.pattern.permute.xlu0 (!%p157_p3), %v443_v3 }
   0x9   : > { %206 = vperm.xlu0 (!%p157_p3), %415, %v203_v2  }
   0xe   : > { %s512_s12 = smov (!%p185_p4, %s430_s12), 1 }
   0xf   : > { %s373_s18 = sshll.u32 %s512_s12, 4  ;;  %s369_s24 = sshll.u32 %s512_s12, 2 }
  0x10   : > { %s192_s21 = scalar_lea.vmem %s505_s2, %s373_s18  ;;  %s199_s27 = scalar_lea.vmem %s506_s3, %s369_s24 }
  0x11   : > { %v201_v4 = vld [vmem:[%s192_s21] sm:$0xff]  ;;  %v202_v5 = vld [vmem:[%s192_s21 + $0x8] sm:$0xff] }
  0x12   : > { %v385_v6 = vpack.c.bf16 %v202_v5, %v201_v4 }
  0x14   : > { %386 = vmatpush3.bf16.msra.mxu0 %v385_v6 }
  0x17   : > { %382 = vmatmul.mubr.msk.f32.vlgmr.msra.gmra.mrb[0].mxu0 %vm209_vm1, %v200_v7 }
  0x88   : > { %v207_v8 = vpop.permute.xlu0 %206 }
  0xea   : > { %v279_v9 = vpop.f32.mrb[0].mxu0 }
  0xeb   : > { %v280_v10 = vadd.f32 %v279_v9, %v207_v8  ;;  %v383_v11 = vpop.f32.mrb[1].mxu0 }
  0xed   : > { %284 = vst.msk [vmem:[%s199_s27] sm:$0xf] %vm283_vm2, %v280_v10 }
  0xee PF: > { %s13_s14 = sadd.s32 1, %s438_s14   ;;  %s507_s12 = smov %s434_s13 }
  0xef   : > { %p10_p5 = scmp.ge.s32.totalorder %s13_s14, 4   ;;  %s508_s13 = smov %s510_s15 }
  0xf1   :  { %12 = sbr.rel (!%p10_p5) target bundleno = 2 (0x2), region = 62 }

</bundles_post_ra>
